<compile_context>
chip_gen: v6e
topology: v6e:2x2x1
jax: 0.10.0
libtpu: 0.0.40
codegen_flags: <defaults>
</compile_context>

<pallas_src>
import jax
import jax.numpy as jnp
import numpy as np
from jax import lax
from jax.experimental import pallas as pl
from jax.experimental.pallas import tpu as pltpu

BN_EPS = 1e-5        # nn.BatchNorm1d default eps
NORM_EPS = 1e-12     # F.normalize default eps
VMEM_LIMIT_BYTES = 32 * 1024 * 1024   # >= every generation's default scoped VMEM

# Contract the last dim of both operands: A @ B.T without materializing B.T.
_DN_NT = (((1,), (1,)), ((), ()))


def _pick_batch_tile(n, target):
    """Largest divisor of n (<= target) that keeps sublane-friendly tiles."""
    if n <= target:
        return n
    for t in range(min(target, n), 15, -1):      # prefer multiples of 16 (bf16 packing)
        if n % t == 0 and t % 16 == 0:
            return t
    for t in range(min(target, n), 7, -1):       # fall back to multiples of 8
        if n % t == 0 and t % 8 == 0:
            return t
    return n                                     # last resort: single block


# ---------------------------------------------------------------------------
# Pass 1: h = x @ W1^T + b1 (per batch tile) + per-tile BN partial statistics
# ---------------------------------------------------------------------------
def _linear_stats_kernel(x_ref, w1_ref, b1_ref, h_ref, ssum_ref, ssq_ref):
    # MXU matmul: bf16 operands, f32 accumulation.
    h = lax.dot_general(x_ref[...], w1_ref[...], _DN_NT,
                        preferred_element_type=jnp.float32)
    h = h + b1_ref[...]                                     # (tb, hid) f32
    h_ref[...] = h.astype(h_ref.dtype)                      # bf16 intermediate
    # Partial BatchNorm statistics for this tile (kept in f32).
    ssum_ref[...] = jnp.sum(h, axis=0, keepdims=True)[None]       # (1, 1, hid)
    ssq_ref[...] = jnp.sum(h * h, axis=0, keepdims=True)[None]    # (1, 1, hid)


def _linear_with_stats(x, w1, b1, tb):
    n, in_fea = x.shape
    hid = w1.shape[0]
    g = n // tb
    return pl.pallas_call(
        _linear_stats_kernel,
        grid=(g,),
        in_specs=[
            pl.BlockSpec((tb, in_fea), lambda i: (i, 0)),      # x tile
            pl.BlockSpec((hid, in_fea), lambda i: (0, 0)),     # W1 (untransposed)
            pl.BlockSpec((1, hid), lambda i: (0, 0)),          # b1
        ],
        out_specs=[
            pl.BlockSpec((tb, hid), lambda i: (i, 0)),         # h tile
            pl.BlockSpec((1, 1, hid), lambda i: (i, 0, 0)),    # per-tile sum
            pl.BlockSpec((1, 1, hid), lambda i: (i, 0, 0)),    # per-tile sum of squares
        ],
        out_shape=[
            jax.ShapeDtypeStruct((n, hid), jnp.bfloat16),
            jax.ShapeDtypeStruct((g, 1, hid), jnp.float32),
            jax.ShapeDtypeStruct((g, 1, hid), jnp.float32),
        ],
        compiler_params=pltpu.CompilerParams(
            dimension_semantics=("parallel",),
            vmem_limit_bytes=VMEM_LIMIT_BYTES),
    )(x, w1, b1)


# ---------------------------------------------------------------------------
# Pass 2: BN (folded scale/shift) -> ReLU -> Linear -> row L2 normalize
# ---------------------------------------------------------------------------
def _bn_relu_linear_norm_kernel(h_ref, scale_ref, shift_ref, w2_ref, b2_ref, o_ref):
    a = h_ref[...].astype(jnp.float32) * scale_ref[...] + shift_ref[...]   # BN (f32)
    a = jnp.maximum(a, 0.0)                                                # ReLU
    y = lax.dot_general(a.astype(w2_ref.dtype), w2_ref[...], _DN_NT,
                        preferred_element_type=jnp.float32)
    y = y + b2_ref[...]
    # F.normalize(dim=1): x / max(||x||_2, eps)
    nrm = jnp.sqrt(jnp.sum(y * y, axis=1, keepdims=True))
    o_ref[...] = (y / jnp.maximum(nrm, NORM_EPS)).astype(o_ref.dtype)


def _bn_relu_linear_norm(h, scale, shift, w2, b2, tb):
    n, hid = h.shape
    out_fea = w2.shape[0]
    g = n // tb
    return pl.pallas_call(
        _bn_relu_linear_norm_kernel,
        grid=(g,),
        in_specs=[
            pl.BlockSpec((tb, hid), lambda i: (i, 0)),         # h tile
            pl.BlockSpec((1, hid), lambda i: (0, 0)),          # BN scale
            pl.BlockSpec((1, hid), lambda i: (0, 0)),          # BN shift
            pl.BlockSpec((out_fea, hid), lambda i: (0, 0)),    # W2 (untransposed)
            pl.BlockSpec((1, out_fea), lambda i: (0, 0)),      # b2
        ],
        out_specs=pl.BlockSpec((tb, out_fea), lambda i: (i, 0)),
        out_shape=jax.ShapeDtypeStruct((n, out_fea), jnp.float32),
        compiler_params=pltpu.CompilerParams(
            dimension_semantics=("parallel",),
            vmem_limit_bytes=VMEM_LIMIT_BYTES),
    )(h, scale, shift, w2, b2)


# ---------------------------------------------------------------------------
# Module wrapper (parameter setup + tiny glue in plain JAX)
# ---------------------------------------------------------------------------
def init_classifier_params(key, in_fea, hid_fea, out_fea):
    k1, k2, k3, k4 = jax.random.split(key, 4)
    lim1 = 1.0 / np.sqrt(in_fea)
    lim2 = 1.0 / np.sqrt(hid_fea)
    w1 = jax.random.uniform(k1, (hid_fea, in_fea), jnp.float32, -lim1, lim1)
    b1 = jax.random.uniform(k2, (hid_fea,), jnp.float32, -lim1, lim1)
    gamma = jnp.ones((hid_fea,), jnp.float32)    # BatchNorm weight init
    beta = jnp.zeros((hid_fea,), jnp.float32)    # BatchNorm bias init
    w2 = jax.random.uniform(k3, (out_fea, hid_fea), jnp.float32, -lim2, lim2)
    b2 = jax.random.uniform(k4, (out_fea,), jnp.float32, -lim2, lim2)
    return (w1, b1, gamma, beta, w2, b2)


class ClassifierPallas:
    """Pallas-TPU port of the PyTorch Classifier (train-mode BatchNorm1d)."""

    def __init__(self, in_fea, hid_fea, out_fea, drop_out=0.5, key=None,
                 batch_tile=512):
        # drop_out is accepted for API parity; the reference forward never uses it.
        del drop_out
        key = jax.random.PRNGKey(0) if key is None else key
        self.params = init_classifier_params(key, in_fea, hid_fea, out_fea)
        self.batch_tile = batch_tile

    def forward(self, doc_fea):
        w1, b1, gamma, beta, w2, b2 = self.params
        n = doc_fea.shape[0]
        tb = _pick_batch_tile(n, self.batch_tile)

        # bf16 operands for the MXU (f32 accumulation inside the kernels).
        x_bf = doc_fea.astype(jnp.bfloat16)
        w1_bf = w1.astype(jnp.bfloat16)
        w2_bf = w2.astype(jnp.bfloat16)

        # Pass 1: first Linear + per-tile BatchNorm partial statistics.
        h, ssum, ssq = _linear_with_stats(x_bf, w1_bf, b1.reshape(1, -1), tb)

        # Tiny cross-tile reduction + BN affine folding (plain JAX, f32).
        mean = jnp.sum(ssum, axis=(0, 1)) / n
        msq = jnp.sum(ssq, axis=(0, 1)) / n
        var = jnp.maximum(msq - mean * mean, 0.0)           # biased, train-mode
        rstd = lax.rsqrt(var + BN_EPS)
        scale = (gamma * rstd).reshape(1, -1)
        shift = (beta - mean * gamma * rstd).reshape(1, -1)

        # Pass 2: BN -> ReLU -> second Linear -> row L2 normalize.
        return _bn_relu_linear_norm(h, scale, shift, w2_bf, b2.reshape(1, -1), tb)

    __call__ = forward


# ---------------------------------------------------------------------------
# Pure-JAX f32 reference for correctness checking
# ---------------------------------------------------------------------------
def reference_forward(x, params):
    w1, b1, gamma, beta, w2, b2 = params
    h = x @ w1.T + b1
    mean = h.mean(axis=0)
    var = ((h - mean) ** 2).mean(axis=0)            # biased (train-mode) variance
    h = (h - mean) / jnp.sqrt(var + BN_EPS) * gamma + beta
    h = jnp.maximum(h, 0.0)
    y = h @ w2.T + b2
    nrm = jnp.linalg.norm(y, axis=1, keepdims=True)
    return y / jnp.maximum(nrm, NORM_EPS)


if __name__ == "__main__":
    key = jax.random.PRNGKey(0)
    kx, km = jax.random.split(key)

    # Small demo shapes; 128-wide hidden/output keeps every store lane-dense,
    # batch_tile=128 gives a 2-step "parallel" grid so the tiling path is used.
    N, in_fea, hid_fea, out_fea = 256, 96, 128, 128

    doc_fea = jax.random.normal(kx, (N, in_fea), jnp.float32)
    model = ClassifierPallas(in_fea, hid_fea, out_fea, key=km, batch_tile=128)

    z = model.forward(doc_fea)
    z = jax.block_until_ready(z)
    assert z.shape == (N, out_fea)

    ref = reference_forward(doc_fea, model.params)
    max_err = float(jnp.max(jnp.abs(z - ref)))
    # bf16 matmul operands with f32 accumulation / statistics -> loose-ish tol.
    assert jnp.allclose(z, ref, rtol=3e-2, atol=3e-3), f"max |err| = {max_err}"

    print("KERNEL_OK")
</pallas_src>

<mosaic_0001>
module attributes {stable_mosaic.version = 11 : i64} {
  func.func @_linear_stats_kernel(%arg0: i32, %arg1: memref<128x96xbf16, #tpu.memory_space<vmem>>, %arg2: memref<128x96xbf16, #tpu.memory_space<vmem>>, %arg3: memref<1x128xf32, #tpu.memory_space<vmem>>, %arg4: memref<128x128xbf16, #tpu.memory_space<vmem>>, %arg5: memref<1x1x128xf32, #tpu.memory_space<vmem>>, %arg6: memref<1x1x128xf32, #tpu.memory_space<vmem>>) attributes {dimension_semantics = [#tpu.dimension_semantics<parallel>], iteration_bounds = array<i64: 2>, scalar_prefetch = 0 : i64, scratch_operands = 0 : i64, tpu.core_type = #tpu.core_type<tc>, window_params = [{transform_indices = @transform_0, window_bounds = array<i64: 128, 96>}, {pipeline_mode = #tpu.pipeline_mode<synchronous>, transform_indices = @transform_1, window_bounds = array<i64: 128, 96>}, {pipeline_mode = #tpu.pipeline_mode<synchronous>, transform_indices = @transform_2, window_bounds = array<i64: 1, 128>}, {transform_indices = @transform_3, window_bounds = array<i64: 128, 128>}, {transform_indices = @transform_4, window_bounds = array<i64: 1, 1, 128>}, {transform_indices = @transform_5, window_bounds = array<i64: 1, 1, 128>}]} {
    %c0 = arith.constant 0 : index
    %c0_0 = arith.constant 0 : index
    %0 = vector.load %arg1[%c0, %c0_0] : memref<128x96xbf16, #tpu.memory_space<vmem>>, vector<128x96xbf16>
    %c0_1 = arith.constant 0 : index
    %c0_2 = arith.constant 0 : index
    %1 = vector.load %arg2[%c0_1, %c0_2] : memref<128x96xbf16, #tpu.memory_space<vmem>>, vector<128x96xbf16>
    %cst = arith.constant dense<0.000000e+00> : vector<128x128xf32>
    %2 = tpu.matmul %0, %1, %cst {dimension_numbers = #tpu.dot_dimension_numbers<[1], [1], [0], [0], [0, 0, 1, 0], [], []>} : vector<128x96xbf16>, vector<128x96xbf16>, vector<128x128xf32> -> vector<128x128xf32>
    %c0_3 = arith.constant 0 : index
    %c0_4 = arith.constant 0 : index
    %3 = vector.load %arg3[%c0_3, %c0_4] : memref<1x128xf32, #tpu.memory_space<vmem>>, vector<1x128xf32>
    %4 = vector.broadcast %3 : vector<1x128xf32> to vector<128x128xf32>
    %5 = arith.addf %2, %4 : vector<128x128xf32>
    %6 = arith.truncf %5 : vector<128x128xf32> to vector<128x128xbf16>
    %c0_5 = arith.constant 0 : index
    %c0_6 = arith.constant 0 : index
    %7 = vector.load %arg4[%c0_5, %c0_6] : memref<128x128xbf16, #tpu.memory_space<vmem>>, vector<128x128xbf16>
    tpu.vector_store %arg4[%c0_5, %c0_6], %6 {strides = array<i32>} : memref<128x128xbf16, #tpu.memory_space<vmem>>, vector<128x128xbf16>,
    %cst_7 = arith.constant dense<0.000000e+00> : vector<128xf32>
    %8 = vector.multi_reduction <add>, %5, %cst_7 [0] : vector<128x128xf32> to vector<128xf32>
    %9 = vector.shape_cast %8 : vector<128xf32> to vector<1x128xf32>
    %10 = vector.shape_cast %9 : vector<1x128xf32> to vector<1x1x128xf32>
    %c0_8 = arith.constant 0 : index
    %c0_9 = arith.constant 0 : index
    %c0_10 = arith.constant 0 : index
    %11 = vector.load %arg5[%c0_8, %c0_9, %c0_10] : memref<1x1x128xf32, #tpu.memory_space<vmem>>, vector<1x1x128xf32>
    tpu.vector_store %arg5[%c0_8, %c0_9, %c0_10], %10 {strides = array<i32>} : memref<1x1x128xf32, #tpu.memory_space<vmem>>, vector<1x1x128xf32>,
    %12 = arith.mulf %5, %5 : vector<128x128xf32>
    %cst_11 = arith.constant dense<0.000000e+00> : vector<128xf32>
    %13 = vector.multi_reduction <add>, %12, %cst_11 [0] : vector<128x128xf32> to vector<128xf32>
    %14 = vector.shape_cast %13 : vector<128xf32> to vector<1x128xf32>
    %15 = vector.shape_cast %14 : vector<1x128xf32> to vector<1x1x128xf32>
    %c0_12 = arith.constant 0 : index
    %c0_13 = arith.constant 0 : index
    %c0_14 = arith.constant 0 : index
    %16 = vector.load %arg6[%c0_12, %c0_13, %c0_14] : memref<1x1x128xf32, #tpu.memory_space<vmem>>, vector<1x1x128xf32>
    tpu.vector_store %arg6[%c0_12, %c0_13, %c0_14], %15 {strides = array<i32>} : memref<1x1x128xf32, #tpu.memory_space<vmem>>, vector<1x1x128xf32>,
    return
  }
  func.func @transform_0(%arg0: i32) -> (i32, i32) {
    %c0_i32 = arith.constant 0 : i32
    %c0_i32_0 = arith.constant 0 : i32
    return %arg0, %c0_i32 : i32, i32
  }
  func.func @transform_1(%arg0: i32) -> (i32, i32) {
    %c0_i32 = arith.constant 0 : i32
    %c0_i32_0 = arith.constant 0 : i32
    %c0_i32_1 = arith.constant 0 : i32
    return %c0_i32, %c0_i32_0 : i32, i32
  }
  func.func @transform_2(%arg0: i32) -> (i32, i32) {
    %c0_i32 = arith.constant 0 : i32
    %c0_i32_0 = arith.constant 0 : i32
    %c0_i32_1 = arith.constant 0 : i32
    return %c0_i32, %c0_i32_0 : i32, i32
  }
  func.func @transform_3(%arg0: i32) -> (i32, i32) {
    %c0_i32 = arith.constant 0 : i32
    %c0_i32_0 = arith.constant 0 : i32
    return %arg0, %c0_i32 : i32, i32
  }
  func.func @transform_4(%arg0: i32) -> (i32, i32, i32) {
    %c0_i32 = arith.constant 0 : i32
    %c0_i32_0 = arith.constant 0 : i32
    %c0_i32_1 = arith.constant 0 : i32
    return %arg0, %c0_i32, %c0_i32_0 : i32, i32, i32
  }
  func.func @transform_5(%arg0: i32) -> (i32, i32, i32) {
    %c0_i32 = arith.constant 0 : i32
    %c0_i32_0 = arith.constant 0 : i32
    %c0_i32_1 = arith.constant 0 : i32
    return %arg0, %c0_i32, %c0_i32_0 : i32, i32, i32
  }
}

</mosaic_0001>

<bundles_post_ra>
// kernel: tpu_custom_call.1
= control target key start
LH: loop header
LB: loop body
LE: loop exit
PB: predicated region body
PF: predicated region fallthrough
CT: control target
= control target key end

     0   :  { %11 = vsyncpa [#allocation3], 0  ;;  %s1531_s0 = inlined_call_operand.vmem [shape: bf16[256,96], index: 0, kind: input, shape index: {}]   ;;  %s1532_s1 = inlined_call_operand.vmem [shape: bf16[128,96], index: 1, kind: input, shape index: {}]   ;;  %s1533_s2 = inlined_call_operand.vmem [shape: f32[1,128], index: 2, kind: input, shape index: {}]   ;;  %s1534_s3 = inlined_call_operand.hbm [shape: bf16[256,128], index: 3, kind: output, shape index: {0}]   ;;  %s1535_s4 = inlined_call_operand.hbm [shape: f32[2,1,128], index: 4, kind: output, shape index: {1}]   ;;  %s1536_s5 = inlined_call_operand.hbm [shape: f32[2,1,128], index: 5, kind: output, shape index: {2}]  }
   0x1   :  { %13 = vsyncpa [#allocation3 + $0x1], 0 }
   0x2   :  { %14 = vsyncpa [#allocation5], 0 }
   0x3   :  { %16 = vsyncpa [#allocation5 + $0x1], 0  ;;  %s1230_s18 = smov 0   ;;  %s1232_s19 = smov 0  }
   0x4   :  { %s1234_s20 = smov 0   ;;  %s1236_s21 = smov 0  }
   0x5 LB: > { %s1251_s22 = sadd.s32 4294967295, %s1193_s21   ;;  %s811_s23 = sadd.s32 4294967294, %s1193_s21   ;;  %s1193_s21 = sphi %s1236_s21, %s1542_s21   ;;  %s1189_s20 = sphi %s1234_s20, %s1541_s20   ;;  %s1185_s19 = sphi %s1232_s19, %s1540_s19   ;;  %s1181_s18 = sphi %s1230_s18, %s1539_s18  }
   0x6   : > { %s1255_s24 = sadd.s32 1, %s1193_s21   ;;  %s97_s25 = sadd.s32 1, %s1189_s20 }
   0x7   : > { %s94_s26 = ssub.s32 %s1193_s21, %s1255_s24  ;;  %p107_p0 = scmp.ne.s32.totalorder %s1189_s20, %s1185_s19 }
   0x8   : > { %p95_p1 = scmp.eq.s32.totalorder %s94_s26, 0  ;;  %p108_p2 = scmp.eq.s32.totalorder %s1251_s22, 1 }
   0x9   : > { %p113_p3 = scmp.ne.s32.totalorder %s1185_s19, %s1181_s18  ;;  %p114_p4 = scmp.eq.s32.totalorder %s811_s23, 1 }
   0xa   : > { %s1268_s27 = scalar_select %p95_p1, %s1189_s20, %s97_s25  }
   0xb   : > { %p1270_p5 = por %p108_p2, %p107_p0  ;;  %p1274_p6 = por %p114_p4, %p113_p3 }
   0xc   : > { %p814_p7 = scmp.ge.s32.totalorder %s1193_s21, 1  ;;  %p199_p8 = scmp.lt.s32.totalorder %s1193_s21, 3 }
   0xe   : > { %p200_p9 = pnand %p814_p7, %p199_p8 }
   0xf   : > { %s1292_s9 = sshll.u32 (!%p200_p9), %s1251_s22, 4  ;;  %s882_s25 = sshll.u32 (!%p200_p9), %s1251_s22, 10 }
  0x10   : > { %203 = sbr.rel (%p200_p9) target bundleno = 374 (0x176), region = 32  ;;  %p236_p10 = scmp.lt.s32.totalorder (!%p200_p9), %s1292_s9, 31 }
  0x11   : > { %s1393_s7 = scalar_lea.hbm (!%p200_p9), %s1534_s3, %s882_s25  ;;  %s1195_s11 = smov (!%p200_p9), [#allocation2]  }
  0x15   : > { %v1061_v0 = vld [vmem:[%s1532_s1 + $0x38] sm:$0xff]   ;;  %vm362_vm0 = vcmask 785408   ;;  %v1062_v1 = vld [vmem:[%s1532_s1 + $0x30] sm:$0xff]   ;;  %v1063_v4 = vld [vmem:[%s1532_s1 + $0x28] sm:$0xff]   ;;  %s237_s12 = scalar_select %p236_p10, %s1292_s9, 31 }
  0x16   : > { %994 = vmatprep.subr.msk.bf16.mxu0 %vm362_vm0, %v1061_v0  ;;  %v409_v2 = vsel %vm362_vm0, %v1061_v0, 0  ;;  %995 = vmatprep.subr.msk.bf16.mxu1 %vm362_vm0, %v1061_v0  ;;  %v406_v3 = vsel %vm362_vm0, %v1062_v1, 0  ;;  %v403_v6 = vsel %vm362_vm0, %v1063_v4, 0  ;;  %v1064_v7 = vld [vmem:[%s1532_s1 + $0x20] sm:$0xff]   ;;  %v1065_v10 = vld [vmem:[%s1532_s1 + $0x18] sm:$0xff]   ;;  %v1066_v12 = vld [vmem:[%s1532_s1 + $0x10] sm:$0xff]  }
  0x17   : > { %947 = vmatpush3.bf16.xpose.msra.mxu0 %v409_v2  ;;  %986 = vmatpush3.bf16.xpose.msra.mxu1 %v409_v2  ;;  %s817_s13 = sshll.u32 %s237_s12, 2  ;;  %v400_v9 = vsel %vm362_vm0, %v1064_v7, 0  ;;  %v397_v11 = vsel %vm362_vm0, %v1065_v10, 0  ;;  %v394_v13 = vsel %vm362_vm0, %v1066_v12, 0  ;;  %v1067_v14 = vld [vmem:[%s1532_s1 + $0x8] sm:$0xff]   ;;  %v1068_v16 = vld [vmem:[%s1532_s1] sm:$0xff]  }
  0x18   : > { %996 = vmatprep.subr.msk.bf16.mxu0 %vm362_vm0, %v1062_v1  ;;  %997 = vmatprep.subr.msk.bf16.mxu1 %vm362_vm0, %v1062_v1  ;;  %s1305_s16 = scalar_lea.vmem %s1531_s0, %s817_s13  ;;  %v391_v15 = vsel %vm362_vm0, %v1067_v14, 0  ;;  %v388_v17 = vsel %vm362_vm0, %v1068_v16, 0  ;;  %s1355_s13 = sand.u32 1, %s1185_s19   ;;  %v818_v26 = vld [vmem:[%s1533_s2] ss:$0 sm:$0xff] }
  0x19   : > { %v1069_v5 = vld [vmem:[%s1305_s16] sm:$0xff]   ;;  %v1070_v18 = vld [vmem:[%s1305_s16 + $0x8] sm:$0xff]   ;;  %v1071_v20 = vld [vmem:[%s1305_s16 + $0x10] sm:$0xff]   ;;  %s815_s17 = sshll.u32 %s1355_s13, 6  ;;  %s649_s8 = scalar_lea.sflag [#allocation3], %s1355_s13 }
  0x1a   : > { %962 = vmatprep.mubr.msk.bf16.mxu0 %vm362_vm0, %v1069_v5  ;;  %v1073_v8 = vld [vmem:[%s1305_s16 + $0x20] sm:$0xff]   ;;  %v1074_v19 = vld [vmem:[%s1305_s16 + $0x28] sm:$0xff]   ;;  %v1075_v21 = vld [vmem:[%s1305_s16 + $0x30] sm:$0xff]   ;;  %s1081_s12 = sshll.u32 %s1195_s11, 4  ;;  %s1082_s12 = int_to_ptr.vmem [resolvable:$false] %s1081_s12 }
  0x1b   : > { %970 = vmatprep.mubr.msk.bf16.mxu1 %vm362_vm0, %v1073_v8  ;;  %v1072_v22 = vld [vmem:[%s1305_s16 + $0x18] sm:$0xff]   ;;  %s1083_s14 = scalar_lea.vmem %s1082_s12, 2048 }
  0x1c   : > { %v1076_v23 = vld [vmem:[%s1305_s16 + $0x38] sm:$0xff]   ;;  %s1371_s16 = scalar_lea.vmem [#allocation2], %s815_s17 }
  0x1d   : > { %s670_s26 = sshll.u32 %s1371_s16, 4  ;;  %s1395_s26 = int_to_ptr.vmem [resolvable:$true] %s670_s26 }
  0x1e   : > { %s1077_s10 = scalar_lea.vmem %s1395_s26, 1024  ;;  %p1084_p0 = scmp.lt.s32.totalorder %s1395_s26, %s1082_s12 }
  0x1f   : > { %949 = vmatpush3.bf16.xpose.msra.mxu0 %v406_v3  ;;  %987 = vmatpush3.bf16.xpose.msra.mxu1 %v406_v3  ;;  %p1078_p11 = scmp.ne.s32.totalorder %s1395_s26, %s1077_s10  ;;  %p1085_p1 = scmp.lt.s32.totalorder %s1083_s14, %s1077_s10 }
  0x20   : > { %998 = vmatprep.subr.msk.bf16.mxu0 %vm362_vm0, %v1063_v4  ;;  %999 = vmatprep.subr.msk.bf16.mxu1 %vm362_vm0, %v1063_v4 }
  0x21   : > { %p1079_p12 = pnand %p1078_p11, %p1270_p5  ;;  %p1086_p2 = por %p1085_p1, %p1084_p0 }
  0x23   : > { %p1080_p13 = pneg %p1079_p12 }
  0x25   : > { %p1087_p3 = pnand %p1086_p2, %p1080_p13 }
  0x27   : > { %951 = vmatpush3.bf16.xpose.msra.mxu0 %v403_v6  ;;  %988 = vmatpush3.bf16.xpose.msra.mxu1 %v403_v6 }
  0x28   : > { %1000 = vmatprep.subr.msk.bf16.mxu0 %vm362_vm0, %v1064_v7  ;;  %1001 = vmatprep.subr.msk.bf16.mxu1 %vm362_vm0, %v1064_v7 }
  0x2f   : > { %953 = vmatpush3.bf16.xpose.msra.mxu0 %v400_v9  ;;  %989 = vmatpush3.bf16.xpose.msra.mxu1 %v400_v9 }
  0x30   : > { %1002 = vmatprep.subr.msk.bf16.mxu0 %vm362_vm0, %v1065_v10  ;;  %1003 = vmatprep.subr.msk.bf16.mxu1 %vm362_vm0, %v1065_v10 }
  0x37   : > { %955 = vmatpush3.bf16.xpose.msra.mxu0 %v397_v11  ;;  %990 = vmatpush3.bf16.xpose.msra.mxu1 %v397_v11 }
  0x38   : > { %1004 = vmatprep.subr.msk.bf16.mxu0 %vm362_vm0, %v1066_v12  ;;  %1005 = vmatprep.subr.msk.bf16.mxu1 %vm362_vm0, %v1066_v12 }
  0x3f   : > { %957 = vmatpush3.bf16.xpose.msra.mxu0 %v394_v13  ;;  %991 = vmatpush3.bf16.xpose.msra.mxu1 %v394_v13 }
  0x40   : > { %1006 = vmatprep.subr.msk.bf16.mxu0 %vm362_vm0, %v1067_v14  ;;  %1007 = vmatprep.subr.msk.bf16.mxu1 %vm362_vm0, %v1067_v14 }
  0x47   : > { %959 = vmatpush3.bf16.xpose.msra.mxu0 %v391_v15  ;;  %992 = vmatpush3.bf16.xpose.msra.mxu1 %v391_v15 }
  0x48   : > { %1008 = vmatprep.subr.msk.bf16.mxu0 %vm362_vm0, %v1068_v16  ;;  %1009 = vmatprep.subr.msk.bf16.mxu1 %vm362_vm0, %v1068_v16 }
  0x4f   : > { %961 = vmatpush3.bf16.xpose.msra.mxu0 %v388_v17  ;;  %993 = vmatpush3.bf16.xpose.msra.mxu1 %v388_v17 }
  0x56   : > { %963 = vmatmul.mubr.msk.bf16.vlgmr.msra.gmra.mxu0 %vm362_vm0, %v1070_v18  ;;  %971 = vmatmul.mubr.msk.bf16.vlgmr.msra.gmra.mxu1 %vm362_vm0, %v1074_v19 }
  0x57   : > { %966 = vmatprep.mubr.msk.bf16.mxu0 %vm362_vm0, %v1071_v20  ;;  %974 = vmatprep.mubr.msk.bf16.mxu1 %vm362_vm0, %v1075_v21 }
  0x5e   : > { %967 = vmatmul.mubr.msk.bf16.gmra.mxu0 %vm362_vm0, %v1072_v22  ;;  %975 = vmatmul.mubr.msk.bf16.gmra.mxu1 %vm362_vm0, %v1076_v23 }
 0x116   : > { %v964_v24 = vpop.f32.mrf.mxu0  ;;  %v972_v25 = vpop.f32.mrf.mxu1 }
 0x117   : > { %v1361_v29 = vadd.f32 %v972_v25, %v818_v26  ;;  %v454_v32 = vadd.f32 %v964_v24, %v818_v26 }
 0x118   : > { %v445_v27 = vpop.f32.mrf.mxu0  ;;  %v477_v28 = vpop.f32.mrf.mxu1 }
 0x119   : > { %v446_v33 = vadd.f32 %v818_v26, %v445_v27  ;;  %v1365_v37 = vadd.f32 %v818_v26, %v477_v28  ;;  %v612_v52 = vmul.f32 %v454_v32, %v454_v32 }
 0x11a   : > { %v965_v30 = vpop.f32.mrf.mxu0  ;;  %v973_v31 = vpop.f32.mrf.mxu1 }
 0x11b   : > { %v457_v34 = vadd.f32 %v965_v30, %v818_v26  ;;  %v1363_v35 = vadd.f32 %v973_v31, %v818_v26  ;;  %v610_v45 = vmul.f32 %v446_v33, %v446_v33 }
 0x11c   : > { %v448_v36 = vpop.f32.mrf.mxu0  ;;  %v480_v38 = vpop.f32.mrf.mxu1 }
 0x11d   : > { %v891_v39 = vpack.c.bf16 %v457_v34, %v454_v32  ;;  %v449_v40 = vadd.f32 %v818_v26, %v448_v36  ;;  %v911_v41 = vpack.c.bf16 %v1363_v35, %v1361_v29  ;;  %v1369_v43 = vadd.f32 %v818_v26, %v480_v38 }
 0x11e   : > { %v968_v42 = vpop.f32.mrf.mxu0  ;;  %v976_v44 = vpop.f32.mrf.mxu1  ;;  %v613_v56 = vmul.f32 %v457_v34, %v457_v34 }
 0x11f   : > { %923 = vst [vmem:[%s1371_s16 + $0x8] sm:$0xff] %v891_v39   ;;  %v886_v46 = vpack.c.bf16 %v449_v40, %v446_v33  ;;  %v588_v47 = vadd.f32 %v449_v40, %v446_v33  ;;  %v611_v48 = vmul.f32 %v449_v40, %v449_v40  ;;  %927 = vst [vmem:[%s1371_s16 + $0x28] sm:$0xff] %v911_v41  }
 0x120   : > { %v461_v49 = vpop.f32.mrf.mxu0  ;;  %v906_v50 = vpack.c.bf16 %v1369_v43, %v1365_v37  ;;  %v493_v51 = vpop.f32.mrf.mxu1  ;;  %v1379_v58 = vadd.f32 %v976_v44, %v818_v26  ;;  %v470_v61 = vadd.f32 %v968_v42, %v818_v26 }
 0x121   : > { %887 = vst [vmem:[%s1371_s16] sm:$0xff] %v886_v46   ;;  %v589_v53 = vadd.f32 %v588_v47, %v454_v32  ;;  %v626_v54 = vadd.f32 %v611_v48, %v610_v45  ;;  %v462_v55 = vadd.f32 %v818_v26, %v461_v49  ;;  %v1381_v1 = vadd.f32 %v818_v26, %v493_v51 }
 0x122   : > { %v969_v57 = vpop.f32.mrf.mxu0  ;;  %926 = vst [vmem:[%s1371_s16 + $0x20] sm:$0xff] %v906_v50   ;;  %v977_v59 = vpop.f32.mrf.mxu1  ;;  %v616_v16 = vmul.f32 %v470_v61, %v470_v61 }
 0x123   : > { %v627_v60 = vadd.f32 %v626_v54, %v612_v52  ;;  %v590_v62 = vadd.f32 %v589_v53, %v457_v34  ;;  %v473_v63 = vadd.f32 %v969_v57, %v818_v26  ;;  %v1383_v2 = vadd.f32 %v977_v59, %v818_v26 }
 0x124   : > { %v464_v0 = vpop.f32.mrf.mxu0  ;;  %v496_v3 = vpop.f32.mrf.mxu1  ;;  %v614_v5 = vmul.f32 %v462_v55, %v462_v55 }
 0x125   : > { %v591_v4 = vadd.f32 %v590_v62, %v462_v55  ;;  %v628_v6 = vadd.f32 %v627_v60, %v613_v56  ;;  %v901_v7 = vpack.c.bf16 %v473_v63, %v470_v61  ;;  %v465_v8 = vadd.f32 %v818_v26, %v464_v0 }
 0x126   : > { %v921_v9 = vpack.c.bf16 %v1383_v2, %v1379_v58  ;;  %v497_v10 = vadd.f32 %v818_v26, %v496_v3 }
 0x127   : > { %v629_v11 = vadd.f32 %v628_v6, %v614_v5  ;;  %925 = vst [vmem:[%s1371_s16 + $0x18] sm:$0xff] %v901_v7   ;;  %v896_v12 = vpack.c.bf16 %v465_v8, %v462_v55  ;;  %v592_v13 = vadd.f32 %v591_v4, %v465_v8  ;;  %v615_v14 = vmul.f32 %v465_v8, %v465_v8 }
 0x128   : > { %929 = vst [vmem:[%s1371_s16 + $0x38] sm:$0xff] %v921_v9   ;;  %v916_v15 = vpack.c.bf16 %v497_v10, %v1381_v1 }
 0x129   : > { %924 = vst [vmem:[%s1371_s16 + $0x10] sm:$0xff] %v896_v12   ;;  %v593_v17 = vadd.f32 %v592_v13, %v470_v61  ;;  %v630_v18 = vadd.f32 %v629_v11, %v615_v14 }
 0x12a   : > { %928 = vst [vmem:[%s1371_s16 + $0x30] sm:$0xff] %v916_v15  }
 0x12b   : > { %1090 = shalt.err (!%p1087_p3)
}
 0x12c   : > { %s1091_s15 = scalar_lea.hbm %s1393_s7, 1024  ;;  %s1095_s25 = scalar_lea.hbm %s1534_s3, 2048 }
 0x12d   : > { %p1092_p4 = scmp.ne.s32.totalorder %s1393_s7, %s1091_s15  ;;  %p1096_p9 = scmp.lt.s32.totalorder %s1393_s7, %s1534_s3 }
 0x12e   : > { %p1097_p10 = scmp.lt.s32.totalorder %s1095_s25, %s1091_s15 }
 0x12f   : > { %p1093_p7 = pnand %p1092_p4, %p1270_p5 }
 0x130   : > { %p1098_p11 = por %p1097_p10, %p1096_p9 }
 0x131   : > { %p1094_p8 = pneg %p1093_p7 }
 0x133   : > { %p1099_p12 = pnand %p1098_p11, %p1094_p8 }
 0x135   : > { %1102 = shalt.err (!%p1099_p12)
}
 0x136   : > { %s1196_s10 = smov 64   ;;  %s1197_s11 = smov 4   ;;  %v617_v19 = vmul.f32 %v473_v63, %v473_v63  ;;  %v631_v20 = vadd.f32 %v630_v18, %v616_v16  ;;  %v594_v21 = vadd.f32 %v593_v17, %v473_v63  ;;  %v618_v22 = vmul.f32 %v1365_v37, %v1365_v37 }
 0x137   : > { %1010 = dma.vmem_to_hbm [thread:$0]  (%p1270_p5), %s1395_s26, 1024, %s1393_s7, %s649_s8, %s1196_s10, %s1196_s10, %s1197_s11   ;;  %v619_v26 = vmul.f32 %v1369_v43, %v1369_v43  ;;  %v620_v28 = vmul.f32 %v1361_v29, %v1361_v29  ;;  %v621_v32 = vmul.f32 %v1363_v35, %v1363_v35  ;;  %v623_v41 = vmul.f32 %v497_v10, %v497_v10 }
 0x138   : > { %v595_v23 = vadd.f32 %v594_v21, %v1365_v37  ;;  %v632_v24 = vadd.f32 %v631_v20, %v617_v19  ;;  %v622_v37 = vmul.f32 %v1381_v1, %v1381_v1  ;;  %s653_s26 = sand.u32 1, %s1251_s22   ;;  %s228_s7 = scalar_lea.vmem [#allocation4], %s1355_s13 }
 0x139   : > { %s686_s8 = sshll.u32 %s228_s7, 4  ;;  %s1451_s15 = scalar_lea.hbm %s1535_s4, %s1292_s9  ;;  %s1456_s8 = int_to_ptr.vmem [resolvable:$true] %s686_s8 }
 0x13a   : > { %v596_v25 = vadd.f32 %v595_v23, %v1369_v43  ;;  %v633_v27 = vadd.f32 %v632_v24, %v618_v22  ;;  %s234_s17 = scalar_lea.vmem [#allocation6], %s1355_s13  ;;  %s1462_s30 = scalar_lea.hbm %s1536_s5, %s1292_s9 }
 0x13b   : > { %s699_s16 = sshll.u32 %s234_s17, 4  ;;  %s1466_s6 = scalar_lea.sflag [#allocation5], %s653_s26  ;;  %s1464_s16 = int_to_ptr.vmem [resolvable:$true] %s699_s16 }
 0x13c   : > { %v597_v30 = vadd.f32 %v596_v25, %v1361_v29  ;;  %v634_v31 = vadd.f32 %v633_v27, %v619_v26  ;;  %v624_v29 = vmul.f32 %v1379_v58, %v1379_v58  ;;  %s1103_s10 = scalar_lea.vmem %s1456_s8, 16  ;;  %s1198_s11 = smov [#allocation4]  }
 0x13d   : > { %p1104_p13 = scmp.ne.s32.totalorder %s1456_s8, %s1103_s10  ;;  %s1107_s12 = sshll.u32 %s1198_s11, 4  ;;  %s1108_s12 = int_to_ptr.vmem [resolvable:$false] %s1107_s12 }
 0x13e   : > { %v635_v33 = vadd.f32 %v634_v31, %v620_v28  ;;  %v598_v34 = vadd.f32 %v597_v30, %v1363_v35  ;;  %v625_v35 = vmul.f32 %v1383_v2, %v1383_v2  ;;  %s1109_s14 = scalar_lea.vmem %s1108_s12, 32  ;;  %p1110_p2 = scmp.lt.s32.totalorder %s1456_s8, %s1108_s12 }
 0x13f   : > { %p1105_p0 = pnand %p1104_p13, %p1270_p5  ;;  %p1111_p3 = scmp.lt.s32.totalorder %s1109_s14, %s1103_s10 }
 0x140   : > { %v599_v36 = vadd.f32 %v598_v34, %v1381_v1  ;;  %v636_v38 = vadd.f32 %v635_v33, %v621_v32 }
 0x141   : > { %p1106_p1 = pneg %p1105_p0  ;;  %p1112_p4 = por %p1111_p3, %p1110_p2 }
 0x142   : > { %v637_v39 = vadd.f32 %v636_v38, %v622_v37  ;;  %v600_v40 = vadd.f32 %v599_v36, %v497_v10 }
 0x143   : > { %p1113_p7 = pnand %p1112_p4, %p1106_p1 }
 0x144   : > { %v601_v42 = vadd.f32 %v600_v40, %v1379_v58  ;;  %v638_v43 = vadd.f32 %v637_v39, %v623_v41 }
 0x146   : > { %v602_v44 = vadd.f32 %v601_v42, %v1383_v2  ;;  %v639_v45 = vadd.f32 %v638_v43, %v624_v29 }
 0x148   : > { %v603_v46 = vrot.slane %v602_v44, 4  ;;  %v640_v47 = vadd.f32 %v639_v45, %v625_v35 }
 0x14a   : > { %v641_v48 = vrot.slane %v640_v47, 4  ;;  %v604_v49 = vadd.f32 %v603_v46, %v602_v44 }
 0x14c   : > { %v605_v50 = vrot.slane %v604_v49, 2  ;;  %v642_v51 = vadd.f32 %v641_v48, %v640_v47 }
 0x14e   : > { %v606_v52 = vadd.f32 %v605_v50, %v604_v49  ;;  %v643_v53 = vrot.slane %v642_v51, 2 }
 0x150   : > { %v607_v54 = vrot.slane %v606_v52, 1  ;;  %v644_v55 = vadd.f32 %v643_v53, %v642_v51 }
 0x152   : > { %v608_v56 = vadd.f32 %v607_v54, %v606_v52  ;;  %v645_v57 = vrot.slane %v644_v55, 1 }
 0x154   : > { %609 = vst [vmem:[%s228_s7] sm:$0x1] %v608_v56  ;;  %v646_v58 = vadd.f32 %v645_v57, %v644_v55 }
 0x155   : > { %1116 = shalt.err (!%p1113_p7)
}
 0x156   : > { %s1117_s9 = scalar_lea.hbm %s1451_s15, 16  ;;  %s1121_s22 = scalar_lea.hbm %s1535_s4, 32 }
 0x157   : > { %p1118_p8 = scmp.ne.s32.totalorder %s1451_s15, %s1117_s9  ;;  %p1122_p11 = scmp.lt.s32.totalorder %s1451_s15, %s1535_s4 }
 0x158   : > { %p1123_p12 = scmp.lt.s32.totalorder %s1121_s22, %s1117_s9 }
 0x159   : > { %p1119_p9 = pnand %p1118_p8, %p1270_p5 }
 0x15a   : > { %p1124_p13 = por %p1123_p12, %p1122_p11 }
 0x15b   : > { %p1120_p10 = pneg %p1119_p9 }
 0x15d   : > { %p1125_p0 = pnand %p1124_p13, %p1120_p10 }
 0x15f   : > { %1128 = shalt.err (!%p1125_p0)
}
 0x160   : > { %1011 = dma.vmem_to_hbm [thread:$0]  (%p1270_p5), %s1456_s8, 16, %s1451_s15, %s1466_s6   ;;  %647 = vst [vmem:[%s234_s17] sm:$0x1] %v646_v58 }
 0x161   : > { %s1129_s10 = scalar_lea.vmem %s1464_s16, 16  ;;  %s1199_s12 = smov [#allocation6]  }
 0x162   : > { %p1130_p1 = scmp.ne.s32.totalorder %s1464_s16, %s1129_s10  ;;  %s1133_s14 = sshll.u32 %s1199_s12, 4  ;;  %s1134_s14 = int_to_ptr.vmem [resolvable:$false] %s1133_s14 }
 0x163   : > { %s1135_s9 = scalar_lea.vmem %s1134_s14, 32  ;;  %p1136_p4 = scmp.lt.s32.totalorder %s1464_s16, %s1134_s14 }
 0x164   : > { %p1131_p2 = pnand %p1130_p1, %p1270_p5  ;;  %p1137_p7 = scmp.lt.s32.totalorder %s1135_s9, %s1129_s10 }
 0x166   : > { %p1132_p3 = pneg %p1131_p2  ;;  %p1138_p8 = por %p1137_p7, %p1136_p4 }
 0x168   : > { %p1139_p9 = pnand %p1138_p8, %p1132_p3 }
 0x16a   : > { %1142 = shalt.err (!%p1139_p9)
}
 0x16b   : > { %s1143_s13 = scalar_lea.hbm %s1462_s30, 16  ;;  %s1147_s17 = scalar_lea.hbm %s1536_s5, 32 }
 0x16c   : > { %p1144_p10 = scmp.ne.s32.totalorder %s1462_s30, %s1143_s13  ;;  %p1148_p13 = scmp.lt.s32.totalorder %s1462_s30, %s1536_s5 }
 0x16d   : > { %p1149_p0 = scmp.lt.s32.totalorder %s1147_s17, %s1143_s13 }
 0x16e   : > { %p1145_p11 = pnand %p1144_p10, %p1270_p5 }
 0x16f   : > { %p1150_p1 = por %p1149_p0, %p1148_p13 }
 0x170   : > { %p1146_p12 = pneg %p1145_p11 }
 0x172   : > { %p1151_p2 = pnand %p1150_p1, %p1146_p12 }
 0x174   : > { %1154 = shalt.err (!%p1151_p2)
}
 0x175   : > { %1012 = dma.vmem_to_hbm [thread:$0]  (%p1270_p5), %s1464_s16, 16, %s1462_s30, %s1466_s6  }
 0x176 PF: > { %p1026_p3 = scmp.ge.s32.totalorder %s1193_s21, 2  ;;  %s711_s22 = sand.u32 1, %s1181_s18  }
 0x177   : > { %s712_s25 = scalar_lea.sflag [#allocation3], %s711_s22 }
 0x178   : > { %p1017_p4 = pnand %p1026_p3, %p1274_p6 }
 0x17a   : > { %p1018_p7 = pneg %p1017_p4 }
 0x17c   : > { %1172 = dma.done.wait (%p1018_p7), %s712_s25, 1024  }
 0x17d   : > { %1174 = vsyncadd (%p1018_p7), %s712_s25, 4294966272  ;;  %s720_s11 = sand.u32 1, %s811_s23  }
 0x17e   : > { %s721_s28 = scalar_lea.sflag [#allocation5], %s720_s11 }
 0x17f   : > { %1176 = dma.done.wait (%p1018_p7), %s721_s28, 32  }
 0x180   : > { %1178 = vsyncadd (%p1018_p7), %s721_s28, 4294967264  ;;  %p19_p5 = scmp.ge.s32.totalorder %s1255_s24, 4   ;;  %s1539_s18 = smov %s1185_s19 }
 0x181   : > { %s1540_s19 = smov %s1189_s20  ;;  %s1541_s20 = smov %s1268_s27 }
 0x182   : > { %s1542_s21 = smov %s1255_s24  ;;  %21 = sbr.rel (!%p19_p5) target bundleno = 5 (0x5), region = 99 }
 0x187   :  { %733 = vsyncpa [#allocation3], 1 }
 0x188   :  { %735 = vsyncpa [#allocation3 + $0x1], 1 }
 0x189   :  { %736 = vsyncpa [#allocation5], 1 }
 0x18a   :  { %738 = vsyncpa [#allocation5 + $0x1], 1 }

</bundles_post_ra>
